<compile_context>
chip_gen: v7x
topology: tpu7x:2x2x1
jax: 0.10.0
libtpu: 0.0.40
codegen_flags: <defaults>
</compile_context>

<pallas_src>
import functools

import jax
import jax.numpy as jnp
from jax import lax
from jax.experimental import pallas as pl
from jax.experimental.pallas import tpu as pltpu

CONFIDENCE = 50.0  # matches the PyTorch default `confidence=50`


def _round_up(x, m):
    return ((x + m - 1) // m) * m


def _cw_loss_kernel(logits_ref, target_ref, out_ref, *, batch, tile_rows):
    """Per-tile CW loss; running sum kept in the resident (1,1) output block."""
    step = pl.program_id(0)

    @pl.when(step == 0)
    def _init():
        out_ref[...] = jnp.zeros_like(out_ref)

    # DMA happens in the input dtype; upcast for the reductions only.
    logits = logits_ref[...].astype(jnp.float32)     # [TB, C]
    target = target_ref[...]                         # [TB, 1] int32
    tb, c = logits.shape

    # One-hot via a (1, C) lane iota compared against the (TB, 1) targets.
    col_ids = lax.broadcasted_iota(jnp.int32, (1, c), 1)
    onehot = col_ids == target                       # [TB, C] bool

    # real  = (onehot * logits).sum(1)
    real = jnp.sum(jnp.where(onehot, logits, 0.0), axis=1, keepdims=True)        # [TB, 1]
    # other = ((1 - onehot) * logits - onehot * 10000).max(1)  (target slot == -10000.0)
    other = jnp.max(jnp.where(onehot, jnp.float32(-10000.0), logits),
                    axis=1, keepdims=True)                                        # [TB, 1]
    # loss = -clamp(real - other + confidence, min=0)
    loss = -jnp.maximum(real - other + jnp.float32(CONFIDENCE), 0.0)              # [TB, 1]

    # Zero out rows of the ragged tail block (rows >= batch read unspecified data).
    if batch % tile_rows != 0:
        row_ids = step * tile_rows + lax.broadcasted_iota(jnp.int32, (tb, 1), 0)
        loss = jnp.where(row_ids < batch, loss, 0.0)

    out_ref[...] += jnp.sum(loss, axis=0, keepdims=True)


def cw_loss(logits, target, num_classes=10, tile_rows=2048):
    """CW loss matching the PyTorch module. logits: [B, C] float, target: [B] int."""
    B, C = logits.shape
    assert C == num_classes

    # Row tile: a multiple of 8 (sublane) that never exceeds B, capped so a
    # double-buffered tile stays a few MiB even after the class axis pads to
    # 128 lanes (safe on v5e/v6e 128 MiB and v7x 64 MiB VMEM with defaults).
    if B >= 8:
        tb = min(int(tile_rows), (B // 8) * 8)
    else:
        tb = B  # block equals the full array dim -> allowed below the (8,128) rule
    n_tiles = pl.cdiv(B, tb)

    target2d = target.astype(jnp.int32).reshape(B, 1)

    kernel = functools.partial(_cw_loss_kernel, batch=B, tile_rows=tb)
    out = pl.pallas_call(
        kernel,
        out_shape=jax.ShapeDtypeStruct((1, 1), jnp.float32),
        grid=(n_tiles,),
        in_specs=[
            pl.BlockSpec((tb, C), lambda i: (i, 0)),
            pl.BlockSpec((tb, 1), lambda i: (i, 0)),
        ],
        out_specs=pl.BlockSpec((1, 1), lambda i: (0, 0)),
        compiler_params=pltpu.CompilerParams(
            dimension_semantics=("arbitrary",),  # running sum carried across tiles
        ),
    )(logits, target2d)
    return out[0, 0]


def cw_loss_ref(logits, target, num_classes=10):
    """Pure-JAX reference mirroring the PyTorch code exactly."""
    logits = logits.astype(jnp.float32)
    onehot = jax.nn.one_hot(target, num_classes, dtype=jnp.float32)
    real = jnp.sum(onehot * logits, axis=1)
    other = jnp.max((1.0 - onehot) * logits - onehot * 10000.0, axis=1)
    loss = -jnp.maximum(real - other + CONFIDENCE, 0.0)
    return jnp.sum(loss)


if __name__ == "__main__":
    num_classes = 10

    key = jax.random.PRNGKey(0)
    k_logits, k_target, k2_logits, k2_target = jax.random.split(key, 4)

    # Small case matching the module's natural shapes: B=8, C=10, f32.
    logits = jax.random.normal(k_logits, (8, num_classes), dtype=jnp.float32) * 5.0
    target = jax.random.randint(k_target, (8,), 0, num_classes, dtype=jnp.int32)

    result = cw_loss(logits, target, num_classes=num_classes)
    jax.block_until_ready(result)
    expected = cw_loss_ref(logits, target, num_classes=num_classes)
    assert jnp.allclose(result, expected, rtol=1e-5, atol=1e-4), (result, expected)

    # Larger, non-8-aligned bf16 case: exercises the batch grid, the ragged tail
    # block with in-kernel row masking, and bf16 streaming (upcast in-kernel).
    logits2 = (jax.random.normal(k2_logits, (700, num_classes), dtype=jnp.float32)
               * 5.0).astype(jnp.bfloat16)
    target2 = jax.random.randint(k2_target, (700,), 0, num_classes, dtype=jnp.int32)

    result2 = cw_loss(logits2, target2, num_classes=num_classes)
    jax.block_until_ready(result2)
    expected2 = cw_loss_ref(logits2, target2, num_classes=num_classes)
    assert jnp.allclose(result2, expected2, rtol=1e-4, atol=5e-2), (result2, expected2)

    print("KERNEL_OK")
</pallas_src>

<mosaic_0001>
module attributes {stable_mosaic.version = 11 : i64} {
  func.func @_cw_loss_kernel(%arg0: i32, %arg1: memref<8x10xf32, #tpu.memory_space<vmem>>, %arg2: memref<8x1xi32, #tpu.memory_space<vmem>>, %arg3: memref<1x1xf32, #tpu.memory_space<vmem>>) attributes {dimension_semantics = [#tpu.dimension_semantics<arbitrary>], iteration_bounds = array<i64: 1>, scalar_prefetch = 0 : i64, scratch_operands = 0 : i64, tpu.core_type = #tpu.core_type<tc>, window_params = [{transform_indices = @transform_0, window_bounds = array<i64: 8, 10>}, {transform_indices = @transform_1, window_bounds = array<i64: 8, 1>}, {pipeline_mode = #tpu.pipeline_mode<synchronous>, transform_indices = @transform_2, window_bounds = array<i64: 1, 1>}]} {
    %c0_i32 = arith.constant 0 : i32
    %0 = arith.cmpi eq, %arg0, %c0_i32 : i32
    %1 = arith.extui %0 : i1 to i32
    %c0_i32_0 = arith.constant 0 : i32
    %2 = arith.cmpi ne, %1, %c0_i32_0 : i32
    scf.if %2 {
      %cst_15 = arith.constant 0.000000e+00 : f32
      %29 = vector.broadcast %cst_15 : f32 to vector<1x1xf32>
      %c0_16 = arith.constant 0 : index
      %c0_17 = arith.constant 0 : index
      %30 = vector.load %arg3[%c0_16, %c0_17] : memref<1x1xf32, #tpu.memory_space<vmem>>, vector<1x1xf32>
      tpu.vector_store %arg3[%c0_16, %c0_17], %29 {strides = array<i32>} : memref<1x1xf32, #tpu.memory_space<vmem>>, vector<1x1xf32>,
    } else {
    }
    %c0 = arith.constant 0 : index
    %c0_1 = arith.constant 0 : index
    %3 = vector.load %arg1[%c0, %c0_1] : memref<8x10xf32, #tpu.memory_space<vmem>>, vector<8x10xf32>
    %c0_2 = arith.constant 0 : index
    %c0_3 = arith.constant 0 : index
    %4 = vector.load %arg2[%c0_2, %c0_3] : memref<8x1xi32, #tpu.memory_space<vmem>>, vector<8x1xi32>
    %5 = tpu.iota {dimensions = array<i32: 1>} : vector<1x10xi32>
    %6 = vector.broadcast %5 : vector<1x10xi32> to vector<8x10xi32>
    %7 = vector.broadcast %4 : vector<8x1xi32> to vector<8x10xi32>
    %8 = arith.cmpi eq, %6, %7 : vector<8x10xi32>
    %cst = arith.constant 0.000000e+00 : f32
    %9 = vector.broadcast %cst : f32 to vector<8x10xf32>
    %10 = arith.select %8, %3, %9 : vector<8x10xi1>, vector<8x10xf32>
    %cst_4 = arith.constant dense<0.000000e+00> : vector<8xf32>
    %11 = vector.multi_reduction <add>, %10, %cst_4 [1] : vector<8x10xf32> to vector<8xf32>
    %12 = vector.shape_cast %11 : vector<8xf32> to vector<8x1xf32>
    %cst_5 = arith.constant -1.000000e+04 : f32
    %13 = vector.broadcast %cst_5 : f32 to vector<8x10xf32>
    %14 = arith.select %8, %13, %3 : vector<8x10xi1>, vector<8x10xf32>
    %cst_6 = arith.constant dense<0xFF800000> : vector<8xf32>
    %15 = vector.multi_reduction <maximumf>, %14, %cst_6 [1] : vector<8x10xf32> to vector<8xf32>
    %16 = vector.shape_cast %15 : vector<8xf32> to vector<8x1xf32>
    %17 = arith.subf %12, %16 : vector<8x1xf32>
    %cst_7 = arith.constant 5.000000e+01 : f32
    %18 = vector.broadcast %cst_7 : f32 to vector<8x1xf32>
    %19 = arith.addf %17, %18 : vector<8x1xf32>
    %cst_8 = arith.constant 0.000000e+00 : f32
    %20 = vector.broadcast %cst_8 : f32 to vector<8x1xf32>
    %21 = arith.maximumf %19, %20 : vector<8x1xf32>
    %cst_9 = arith.constant 0.000000e+00 : f32
    %22 = vector.broadcast %cst_9 : f32 to vector<8x1xf32>
    %23 = arith.subf %22, %21 : vector<8x1xf32>
    %c0_10 = arith.constant 0 : index
    %c0_11 = arith.constant 0 : index
    %24 = vector.load %arg3[%c0_10, %c0_11] : memref<1x1xf32, #tpu.memory_space<vmem>>, vector<1x1xf32>
    %cst_12 = arith.constant dense<0.000000e+00> : vector<1xf32>
    %25 = vector.multi_reduction <add>, %23, %cst_12 [0] : vector<8x1xf32> to vector<1xf32>
    %26 = vector.shape_cast %25 : vector<1xf32> to vector<1x1xf32>
    %27 = arith.addf %24, %26 : vector<1x1xf32>
    %c0_13 = arith.constant 0 : index
    %c0_14 = arith.constant 0 : index
    %28 = vector.load %arg3[%c0_13, %c0_14] : memref<1x1xf32, #tpu.memory_space<vmem>>, vector<1x1xf32>
    tpu.vector_store %arg3[%c0_13, %c0_14], %27 {strides = array<i32>} : memref<1x1xf32, #tpu.memory_space<vmem>>, vector<1x1xf32>,
    return
  }
  func.func @transform_0(%arg0: i32) -> (i32, i32) {
    %c0_i32 = arith.constant 0 : i32
    %c0_i32_0 = arith.constant 0 : i32
    return %arg0, %c0_i32 : i32, i32
  }
  func.func @transform_1(%arg0: i32) -> (i32, i32) {
    %c0_i32 = arith.constant 0 : i32
    %c0_i32_0 = arith.constant 0 : i32
    return %arg0, %c0_i32 : i32, i32
  }
  func.func @transform_2(%arg0: i32) -> (i32, i32) {
    %c0_i32 = arith.constant 0 : i32
    %c0_i32_0 = arith.constant 0 : i32
    %c0_i32_1 = arith.constant 0 : i32
    return %c0_i32, %c0_i32_0 : i32, i32
  }
}

</mosaic_0001>

<bundles_post_ra>
// kernel: tpu_custom_call.1
= control target key start
LH: loop header
LB: loop body
LE: loop exit
PB: predicated region body
PF: predicated region fallthrough
CT: control target
= control target key end

     0   :  { %s129_s0 = inlined_call_operand.vmem [shape: f32[8,10], index: 0, kind: input, shape index: {}]   ;;  %s130_s1 = inlined_call_operand.vmem [shape: s32[8,1], index: 1, kind: input, shape index: {}]   ;;  %s131_s2 = inlined_call_operand.hbm [shape: f32[1,1], index: 2, kind: output, shape index: {}]  }
   0x1   :  { %v19_v0 = vld [vmem:[%s130_s1] sm:$0xff] }
   0x2   :  { %7 = vsyncpa [#allocation3], 0  ;;  %v91_v1 = vmov 0   ;;  %v20_v2 = vlaneseq  ;;  %v18_v4 = vld [vmem:[%s129_s0] sm:$0xff]  ;;  %vm27_vm0 = vcmask 80896   ;;  %vm16_vm2 = vcmask 0  }
   0x3   :  { %66 = vset.pattern.permute.xlu0 %v91_v1  ;;  %v92_v10 = vmov 0.0   ;;  %s93_s0 = smov [#allocation2]  }
   0x4   :  { %23 = vperm.xlu0 %66, %v19_v0   ;;  %v21_v3 = vand.u32 127, %v20_v2  ;;  %17 = vst.msk [vmem:[#allocation2] sm:$0x1] %vm16_vm2, %v92_v10  ;;  %s55_s1 = sshll.u32 %s93_s0, 4  ;;  %s56_s1 = int_to_ptr.vmem [resolvable:$true] %s55_s1 }
   0x5   :  { %s67_s13 = scalar_lea.vmem %s56_s1, 16  ;;  %s71_s14 = scalar_lea.vmem %s56_s1, 32 }
   0x6   :  { %p68_p0 = scmp.ne.s32.totalorder %s56_s1, %s67_s13  ;;  %p72_p1 = scmp.lt.s32.totalorder %s56_s1, %s56_s1 }
   0x7   :  { %p73_p2 = scmp.lt.s32.totalorder %s71_s14, %s67_s13 }
   0x9   :  { %p74_p3 = por %p73_p2, %p72_p1 }
   0xb   :  { %v39_v22 = vld [vmem:[#allocation2] sm:$0x1]  ;;  %p75_p4 = pnand %p74_p3, %p68_p0 }
  0x83   :  { %v24_v5 = vpop.permute.xlu0 %23 }
  0x84   :  { %vm25_vm1 = vcmp.eq.s32.totalorder %v21_v3, %v24_v5 }
  0x85   :  { %v31_v6 = vsel %vm25_vm1, -10000.0, %v18_v4  ;;  %v26_v7 = vsel %vm25_vm1, %v18_v4, 0.0 }
  0x86   :  { %v32_v8 = vsel %vm27_vm0, %v31_v6, -inf  ;;  %v28_v9 = vsel %vm27_vm0, %v26_v7, 0.0 }
  0x87   :  { %33 = vmax.xlane.f32.xlu1 %v32_v8  ;;  %29 = vadd.xlane.f32.xlu0 %v28_v9 }
 0x114   :  { %v34_v11 = vpop.xlane.xlu1 %33  ;;  %v30_v12 = vpop.xlane.xlu0 %29 }
 0x115   :  { %v35_v13 = vsub.f32 %v30_v12, %v34_v11 }
 0x117   :  { %v36_v14 = vadd.f32 50.0, %v35_v13 }
 0x119   :  { %v37_v15 = vmax.f32 %v36_v14, 0.0 }
 0x11b   :  { %v38_v16 = vsub.f32 0.0, %v37_v15 }
 0x11d   :  { %v40_v17 = vrot.slane %v38_v16, 4 }
 0x11f   :  { %v41_v18 = vadd.f32 %v40_v17, %v38_v16 }
 0x121   :  { %v42_v19 = vrot.slane %v41_v18, 2 }
 0x123   :  { %v43_v20 = vadd.f32 %v42_v19, %v41_v18 }
 0x125   :  { %v44_v21 = vrot.slane %v43_v20, 1 }
 0x127   :  { %v45_v23 = vadd.f32 %v44_v21, %v43_v20 }
 0x129   :  { %v46_v24 = vadd.f32 %v45_v23, %v39_v22 }
 0x12b   :  { %48 = vst.msk [vmem:[#allocation2] sm:$0x1] %vm16_vm2, %v46_v24 }
 0x12c   :  { %78 = shalt.err (!%p75_p4)
}
 0x12d   :  { %s79_s17 = scalar_lea.hbm %s131_s2, 16 }
 0x12e   :  { %p80_p5 = scmp.ne.s32.totalorder %s131_s2, %s79_s17  ;;  %p83_p6 = scmp.lt.u32.totalorder %s79_s17, %s131_s2 }
 0x130   :  { %p85_p7 = pnand %p83_p6, %p80_p5 }
 0x132   :  { %88 = shalt.err (!%p85_p7)
}
 0x133   :  { %58 = dma.vmem_to_hbm [thread:$0]  %s56_s1, 16, %s131_s2, [#allocation3]  }
 0x134   :  { %89 = dma.done.wait [#allocation3], 16  }
 0x135   :  { %90 = vsyncadd [#allocation3], 4294967280 }
 0x136   :  { %62 = vsyncpa [#allocation3], 1 }

</bundles_post_ra>
